<compile_context>
chip_gen: v7x
topology: tpu7x:2x2x1
jax: 0.10.0
libtpu: 0.0.40
codegen_flags: <defaults>
</compile_context>

<pallas_src>
import jax
import jax.numpy as jnp
from jax.experimental import pallas as pl
from jax.experimental.pallas import tpu as pltpu

INPUT_SIZE = 31
HIDDEN1 = 64
HIDDEN2 = 32
OUTPUT_SIZE = 4

# Rows of x processed per grid step.  Sized for the *smallest* budget
# (v5e's 16 MiB scoped VMEM): 2 buffers x TB*(31+4)*4 B ~= 1.1 MiB at TB=4096
# in f32 (half that in bf16), plus <20 KiB of resident weights.
MAX_BATCH_TILE = 4096


def _round_up(n, m):
    return ((n + m - 1) // m) * m


def dqn_kernel(x_ref, w1_ref, b1_ref, w2_ref, b2_ref, w3_ref, b3_ref, o_ref):
    x = x_ref[...]
    # fc1 + relu : MXU matmul with f32 accumulation; bias add / relu in f32.
    h1 = jnp.dot(x, w1_ref[...], preferred_element_type=jnp.float32) + b1_ref[...]
    h1 = jnp.maximum(h1, 0.0)
    # fc2 + relu
    h2 = jnp.dot(h1.astype(w2_ref.dtype), w2_ref[...],
                 preferred_element_type=jnp.float32) + b2_ref[...]
    h2 = jnp.maximum(h2, 0.0)
    # fc3 (no activation).
    o_ref[...] = (jnp.dot(h2.astype(w3_ref.dtype), w3_ref[...],
                          preferred_element_type=jnp.float32)
                  + b3_ref[...]).astype(o_ref.dtype)


def dqn_forward(x, params, use_bf16=True):
    """Pallas forward pass. Matches torch: x.view(-1, 31) -> fc1/relu/fc2/relu/fc3."""
    w1, b1, w2, b2, w3, b3 = params
    x2d = x.reshape(-1, INPUT_SIZE).astype(jnp.float32)
    B = x2d.shape[0]

    # Batch tile: multiple of 8 sublanes, capped so VMEM stays bounded
    # independent of B on every TPU generation.
    tb = min(MAX_BATCH_TILE, _round_up(max(B, 1), 8))
    # Pad batch so every grid step is a full block (padded rows masked off below).
    Bp = _round_up(B, tb)
    if Bp != B:
        x2d = jnp.pad(x2d, ((0, Bp - B), (0, 0)))

    # bf16 for the streamed x and for the weights halves HBM read traffic;
    # biases and all accumulation stay f32.
    in_dtype = jnp.bfloat16 if use_bf16 else jnp.float32
    xk = x2d.astype(in_dtype)
    w1k, w2k, w3k = (w.astype(in_dtype) for w in (w1, w2, w3))
    b1k, b2k, b3k = (b.astype(jnp.float32) for b in (b1, b2, b3))

    grid = (Bp // tb,)

    def batch_spec(n):
        return pl.BlockSpec((tb, n), lambda i: (i, 0))

    def resident_spec(shape):
        # Constant block index -> Pallas keeps the tile resident (no re-DMA).
        return pl.BlockSpec(shape, lambda i: (0, 0))

    out = pl.pallas_call(
        dqn_kernel,
        out_shape=jax.ShapeDtypeStruct((Bp, OUTPUT_SIZE), jnp.float32),
        grid=grid,
        in_specs=[
            batch_spec(INPUT_SIZE),
            resident_spec((INPUT_SIZE, HIDDEN1)), resident_spec((1, HIDDEN1)),
            resident_spec((HIDDEN1, HIDDEN2)),    resident_spec((1, HIDDEN2)),
            resident_spec((HIDDEN2, OUTPUT_SIZE)), resident_spec((1, OUTPUT_SIZE)),
        ],
        out_specs=batch_spec(OUTPUT_SIZE),
        compiler_params=pltpu.CompilerParams(
            dimension_semantics=("parallel",),  # shards batch loop across TCs on v7x
        ),
    )(xk, w1k, b1k, w2k, b2k, w3k, b3k)
    return out[:B]


def init_params(key):
    # Deterministic init mirroring nn.Linear defaults: U(-1/sqrt(fan_in), +1/sqrt(fan_in)).
    def linear(key, fan_in, fan_out):
        kw, kb = jax.random.split(key)
        bound = 1.0 / jnp.sqrt(jnp.float32(fan_in))
        w = jax.random.uniform(kw, (fan_in, fan_out), jnp.float32, -bound, bound)
        b = jax.random.uniform(kb, (1, fan_out), jnp.float32, -bound, bound)
        return w, b

    k1, k2, k3 = jax.random.split(key, 3)
    w1, b1 = linear(k1, INPUT_SIZE, HIDDEN1)
    w2, b2 = linear(k2, HIDDEN1, HIDDEN2)
    w3, b3 = linear(k3, HIDDEN2, OUTPUT_SIZE)
    return (w1, b1, w2, b2, w3, b3)


def dqn_reference(x, params):
    w1, b1, w2, b2, w3, b3 = params
    x2d = x.reshape(-1, INPUT_SIZE).astype(jnp.float32)
    h1 = jnp.maximum(x2d @ w1 + b1, 0.0)
    h2 = jnp.maximum(h1 @ w2 + b2, 0.0)
    return h2 @ w3 + b3


if __name__ == "__main__":
    key = jax.random.PRNGKey(0)
    kp, kx1, kx2 = jax.random.split(key, 3)
    params = init_params(kp)

    # --- Small batch, f32 path: exact match vs reference. ---
    batch = 2
    x_small = jax.random.normal(kx1, (batch, INPUT_SIZE), dtype=jnp.float32)
    out_small = jax.block_until_ready(dqn_forward(x_small, params, use_bf16=False))
    ref_small = dqn_reference(x_small, params)
    assert out_small.shape == (batch, OUTPUT_SIZE), out_small.shape
    assert jnp.allclose(out_small, ref_small, atol=1e-5, rtol=1e-5), "f32 mismatch vs reference"

    # --- Larger batch, bf16 streaming path: exercises multi-step grid,
    #     padding of a partial last tile, and resident weight blocks. ---
    big_batch = 6000  # -> tile 4096, grid of 2 with a padded final tile
    x_big = jax.random.normal(kx2, (big_batch, INPUT_SIZE), dtype=jnp.float32)
    out_big = jax.block_until_ready(dqn_forward(x_big, params, use_bf16=True))
    ref_big = dqn_reference(x_big, params)
    assert out_big.shape == (big_batch, OUTPUT_SIZE), out_big.shape
    assert jnp.allclose(out_big, ref_big, atol=5e-2, rtol=5e-2), "bf16 mismatch vs reference"

    print("KERNEL_OK")
</pallas_src>

<mosaic_0001>
module attributes {stable_mosaic.version = 11 : i64} {
  func.func @dqn_kernel(%arg0: i32, %arg1: memref<8x31xf32, #tpu.memory_space<vmem>>, %arg2: memref<31x64xf32, #tpu.memory_space<vmem>>, %arg3: memref<1x64xf32, #tpu.memory_space<vmem>>, %arg4: memref<64x32xf32, #tpu.memory_space<vmem>>, %arg5: memref<1x32xf32, #tpu.memory_space<vmem>>, %arg6: memref<32x4xf32, #tpu.memory_space<vmem>>, %arg7: memref<1x4xf32, #tpu.memory_space<vmem>>, %arg8: memref<8x4xf32, #tpu.memory_space<vmem>>) attributes {dimension_semantics = [#tpu.dimension_semantics<parallel>], iteration_bounds = array<i64: 1>, scalar_prefetch = 0 : i64, scratch_operands = 0 : i64, tpu.core_type = #tpu.core_type<tc>, window_params = [{transform_indices = @transform_0, window_bounds = array<i64: 8, 31>}, {pipeline_mode = #tpu.pipeline_mode<synchronous>, transform_indices = @transform_1, window_bounds = array<i64: 31, 64>}, {pipeline_mode = #tpu.pipeline_mode<synchronous>, transform_indices = @transform_2, window_bounds = array<i64: 1, 64>}, {pipeline_mode = #tpu.pipeline_mode<synchronous>, transform_indices = @transform_3, window_bounds = array<i64: 64, 32>}, {pipeline_mode = #tpu.pipeline_mode<synchronous>, transform_indices = @transform_4, window_bounds = array<i64: 1, 32>}, {pipeline_mode = #tpu.pipeline_mode<synchronous>, transform_indices = @transform_5, window_bounds = array<i64: 32, 4>}, {pipeline_mode = #tpu.pipeline_mode<synchronous>, transform_indices = @transform_6, window_bounds = array<i64: 1, 4>}, {transform_indices = @transform_7, window_bounds = array<i64: 8, 4>}]} {
    %c0 = arith.constant 0 : index
    %c0_0 = arith.constant 0 : index
    %0 = vector.load %arg1[%c0, %c0_0] : memref<8x31xf32, #tpu.memory_space<vmem>>, vector<8x31xf32>
    %c0_1 = arith.constant 0 : index
    %c0_2 = arith.constant 0 : index
    %1 = vector.load %arg2[%c0_1, %c0_2] : memref<31x64xf32, #tpu.memory_space<vmem>>, vector<31x64xf32>
    %cst = arith.constant dense<0.000000e+00> : vector<8x64xf32>
    %2 = tpu.matmul %0, %1, %cst {dimension_numbers = #tpu.dot_dimension_numbers<[1], [0], [0], [1], [0, 0, 1, 1], [], []>} : vector<8x31xf32>, vector<31x64xf32>, vector<8x64xf32> -> vector<8x64xf32>
    %c0_3 = arith.constant 0 : index
    %c0_4 = arith.constant 0 : index
    %3 = vector.load %arg3[%c0_3, %c0_4] : memref<1x64xf32, #tpu.memory_space<vmem>>, vector<1x64xf32>
    %4 = vector.broadcast %3 : vector<1x64xf32> to vector<8x64xf32>
    %5 = arith.addf %2, %4 : vector<8x64xf32>
    %cst_5 = arith.constant 0.000000e+00 : f32
    %6 = vector.broadcast %cst_5 : f32 to vector<8x64xf32>
    %7 = arith.maximumf %5, %6 : vector<8x64xf32>
    %c0_6 = arith.constant 0 : index
    %c0_7 = arith.constant 0 : index
    %8 = vector.load %arg4[%c0_6, %c0_7] : memref<64x32xf32, #tpu.memory_space<vmem>>, vector<64x32xf32>
    %cst_8 = arith.constant dense<0.000000e+00> : vector<8x32xf32>
    %9 = tpu.matmul %7, %8, %cst_8 {dimension_numbers = #tpu.dot_dimension_numbers<[1], [0], [0], [1], [0, 0, 1, 1], [], []>} : vector<8x64xf32>, vector<64x32xf32>, vector<8x32xf32> -> vector<8x32xf32>
    %c0_9 = arith.constant 0 : index
    %c0_10 = arith.constant 0 : index
    %10 = vector.load %arg5[%c0_9, %c0_10] : memref<1x32xf32, #tpu.memory_space<vmem>>, vector<1x32xf32>
    %11 = vector.broadcast %10 : vector<1x32xf32> to vector<8x32xf32>
    %12 = arith.addf %9, %11 : vector<8x32xf32>
    %cst_11 = arith.constant 0.000000e+00 : f32
    %13 = vector.broadcast %cst_11 : f32 to vector<8x32xf32>
    %14 = arith.maximumf %12, %13 : vector<8x32xf32>
    %c0_12 = arith.constant 0 : index
    %c0_13 = arith.constant 0 : index
    %15 = vector.load %arg6[%c0_12, %c0_13] : memref<32x4xf32, #tpu.memory_space<vmem>>, vector<32x4xf32>
    %cst_14 = arith.constant dense<0.000000e+00> : vector<8x4xf32>
    %16 = tpu.matmul %14, %15, %cst_14 {dimension_numbers = #tpu.dot_dimension_numbers<[1], [0], [0], [1], [0, 0, 1, 1], [], []>} : vector<8x32xf32>, vector<32x4xf32>, vector<8x4xf32> -> vector<8x4xf32>
    %c0_15 = arith.constant 0 : index
    %c0_16 = arith.constant 0 : index
    %17 = vector.load %arg7[%c0_15, %c0_16] : memref<1x4xf32, #tpu.memory_space<vmem>>, vector<1x4xf32>
    %18 = vector.broadcast %17 : vector<1x4xf32> to vector<8x4xf32>
    %19 = arith.addf %16, %18 : vector<8x4xf32>
    %c0_17 = arith.constant 0 : index
    %c0_18 = arith.constant 0 : index
    %20 = vector.load %arg8[%c0_17, %c0_18] : memref<8x4xf32, #tpu.memory_space<vmem>>, vector<8x4xf32>
    tpu.vector_store %arg8[%c0_17, %c0_18], %19 {strides = array<i32>} : memref<8x4xf32, #tpu.memory_space<vmem>>, vector<8x4xf32>,
    return
  }
  func.func @transform_0(%arg0: i32) -> (i32, i32) {
    %c0_i32 = arith.constant 0 : i32
    %c0_i32_0 = arith.constant 0 : i32
    return %arg0, %c0_i32 : i32, i32
  }
  func.func @transform_1(%arg0: i32) -> (i32, i32) {
    %c0_i32 = arith.constant 0 : i32
    %c0_i32_0 = arith.constant 0 : i32
    %c0_i32_1 = arith.constant 0 : i32
    return %c0_i32, %c0_i32_0 : i32, i32
  }
  func.func @transform_2(%arg0: i32) -> (i32, i32) {
    %c0_i32 = arith.constant 0 : i32
    %c0_i32_0 = arith.constant 0 : i32
    %c0_i32_1 = arith.constant 0 : i32
    return %c0_i32, %c0_i32_0 : i32, i32
  }
  func.func @transform_3(%arg0: i32) -> (i32, i32) {
    %c0_i32 = arith.constant 0 : i32
    %c0_i32_0 = arith.constant 0 : i32
    %c0_i32_1 = arith.constant 0 : i32
    return %c0_i32, %c0_i32_0 : i32, i32
  }
  func.func @transform_4(%arg0: i32) -> (i32, i32) {
    %c0_i32 = arith.constant 0 : i32
    %c0_i32_0 = arith.constant 0 : i32
    %c0_i32_1 = arith.constant 0 : i32
    return %c0_i32, %c0_i32_0 : i32, i32
  }
  func.func @transform_5(%arg0: i32) -> (i32, i32) {
    %c0_i32 = arith.constant 0 : i32
    %c0_i32_0 = arith.constant 0 : i32
    %c0_i32_1 = arith.constant 0 : i32
    return %c0_i32, %c0_i32_0 : i32, i32
  }
  func.func @transform_6(%arg0: i32) -> (i32, i32) {
    %c0_i32 = arith.constant 0 : i32
    %c0_i32_0 = arith.constant 0 : i32
    %c0_i32_1 = arith.constant 0 : i32
    return %c0_i32, %c0_i32_0 : i32, i32
  }
  func.func @transform_7(%arg0: i32) -> (i32, i32) {
    %c0_i32 = arith.constant 0 : i32
    %c0_i32_0 = arith.constant 0 : i32
    return %arg0, %c0_i32 : i32, i32
  }
}

</mosaic_0001>

<bundles_post_ra>
// kernel: tpu_custom_call.1
= control target key start
LH: loop header
LB: loop body
LE: loop exit
PB: predicated region body
PF: predicated region fallthrough
CT: control target
= control target key end

     0   :  { %v394_v0 = vmov 0.0|0.0   ;;  %vm42_vm0 = vcmask 1046528   ;;  %vm395_vm1 = vmmov 0   ;;  %v396_v6 = vmov 0.0   ;;  %s504_s1 = inlined_call_operand.vmem [shape: f32[31,64], index: 1, kind: input, shape index: {}]   ;;  %s505_s3 = inlined_call_operand.vmem [shape: f32[64,32], index: 3, kind: input, shape index: {}]   ;;  %s506_s0 = inlined_call_operand.vmem [shape: f32[8,31], index: 0, kind: input, shape index: {}]   ;;  %s507_s5 = inlined_call_operand.vmem [shape: f32[32,4], index: 5, kind: input, shape index: {}]   ;;  %s508_s2 = inlined_call_operand.vmem [shape: f32[1,64], index: 2, kind: input, shape index: {}]   ;;  %s509_s4 = inlined_call_operand.vmem [shape: f32[1,32], index: 4, kind: input, shape index: {}]   ;;  %s510_s6 = inlined_call_operand.vmem [shape: f32[1,4], index: 6, kind: input, shape index: {}]   ;;  %s511_s7 = inlined_call_operand.vmem [shape: f32[8,4], index: 7, kind: output, shape index: {}]  }
   0x1   :  { %365 = vmatprep.subr.bf16.mxu0 %v394_v0  ;;  %v27_v1 = vld [vmem:[%s504_s1] sm:$0xff]  ;;  %v28_v2 = vld [vmem:[%s504_s1 + $0x8] sm:$0xff]  ;;  %v29_v3 = vld [vmem:[%s504_s1 + $0x10] sm:$0xff]  ;;  %372 = vmatprep.subr.bf16.mxu1 %v394_v0  ;;  %vm397_vm2 = vmmov 1   ;;  %vm38_vm4 = vcmask 252928   ;;  %vm132_vm5 = vcmask 523264  }
   0x2   :  { %v366_v4 = vpack.c.bf16 %v28_v2, %v27_v1  ;;  %v30_v5 = vld [vmem:[%s504_s1 + $0x18] sm:$0x7f]  ;;  %332 = vmatprep.mubr.msk.f32.mxu0 %vm395_vm1, %v396_v6  ;;  %351 = vmatprep.mubr.msk.f32.mxu1 %vm395_vm1, %v396_v6  ;;  %v117_v7 = vld [vmem:[%s505_s3] sm:$0xff]  ;;  %v118_v8 = vld [vmem:[%s505_s3 + $0x8] sm:$0xff]  ;;  %vm218_vm6 = vcmask 261120   ;;  %vm292_vm7 = vcmask 31744  }
   0x3   :  { %v119_v9 = vld [vmem:[%s505_s3 + $0x10] sm:$0xff]  ;;  %v369_v10 = vpack.c.bf16 %v30_v5, %v29_v3  ;;  %v373_v11 = vpack.c.bf16 %v118_v8, %v117_v7  ;;  %v120_v12 = vld [vmem:[%s505_s3 + $0x18] sm:$0xff]  ;;  %vm370_vm3 = vmpackc.low %vm42_vm0, %vm397_vm2 }
   0x4   :  { %367 = vmatpush3.bf16.msra.mxu0 %v366_v4  ;;  %v376_v13 = vpack.c.bf16 %v120_v12, %v119_v9  ;;  %v121_v14 = vld [vmem:[%s505_s3 + $0x20] sm:$0xff]  ;;  %v122_v15 = vld [vmem:[%s505_s3 + $0x28] sm:$0xff]  ;;  %v123_v18 = vld [vmem:[%s505_s3 + $0x30] sm:$0xff] }
   0x5   :  { %368 = vmatprep.subr.bf16.mxu0 %v394_v0  ;;  %374 = vmatpush3.bf16.msra.mxu1 %v373_v11  ;;  %v26_v16 = vld [vmem:[%s506_s0] sm:$0xff]  ;;  %v379_v17 = vpack.c.bf16 %v122_v15, %v121_v14  ;;  %v124_v19 = vld [vmem:[%s505_s3 + $0x38] sm:$0xff]  ;;  %v208_v22 = vld [vmem:[%s507_s5 + $0x8] sm:$0xff] }
   0x6   :  { %375 = vmatprep.subr.bf16.mxu1 %v394_v0  ;;  %v382_v20 = vpack.c.bf16 %v124_v19, %v123_v18  ;;  %v207_v21 = vld [vmem:[%s507_s5] sm:$0xff]  ;;  %v209_v29 = vld [vmem:[%s507_s5 + $0x10] sm:$0xff]  ;;  %v210_v30 = vld [vmem:[%s507_s5 + $0x18] sm:$0xff] }
   0x7   :  { %v385_v23 = vpack.c.bf16 %v208_v22, %v207_v21  ;;  %v298_v24 = vld [vmem:[%s508_s2] ss:$0 sm:$0xff]  ;;  %v388_v31 = vpack.c.bf16 %v210_v30, %v209_v29 }
   0x8   :  { %371 = vmatpush3.bf16.msk.msra.mxu0 %vm370_vm3, %v369_v10  ;;  %v301_v32 = vld [vmem:[%s509_s4] ss:$0 sm:$0xff] }
   0x9   :  { %384 = vmatprep.subr.bf16.mxu0 %v394_v0  ;;  %377 = vmatpush3.bf16.msra.mxu1 %v376_v13  ;;  %v303_v37 = vld [vmem:[%s510_s6] ss:$0 sm:$0xff] }
   0xa   :  { %378 = vmatprep.subr.bf16.mxu1 %v394_v0 }
   0xb   :  { %333 = vmatmul.mubr.msk.f32.vlgmr.msra.gmra.mrb[0].mxu0 %vm38_vm4, %v26_v16 }
   0xc   :  { %362 = vmatprep.mubr.msk.f32.mxu0 %vm395_vm1, %v396_v6  ;;  %386 = vmatpush3.bf16.msra.mxu0 %v385_v23 }
   0xd   :  { %380 = vmatpush3.bf16.msra.mxu1 %v379_v17  ;;  %387 = vmatprep.subr.bf16.mxu0 %v394_v0 }
   0xe   :  { %381 = vmatprep.subr.bf16.mxu1 %v394_v0 }
  0x10   :  { %389 = vmatpush3.bf16.msra.mxu0 %v388_v31 }
  0x11   :  { %383 = vmatpush3.bf16.msra.mxu1 %v382_v20 }
  0xde   :  { %v112_v25 = vpop.f32.mrb[0].mxu0 }
  0xdf   :  { %v113_v26 = vadd.f32 %v298_v24, %v112_v25  ;;  %v334_v27 = vpop.f32.mrb[1].mxu0 }
  0xe1   :  { %v116_v28 = vmax.f32 %v113_v26, 0.0 }
  0xe3   :  { %352 = vmatmul.mubr.msk.f32.vlgmr.msra.gmra.mrb[0].mxu1 %vm132_vm5, %v116_v28 }
 0x1b6   :  { %v202_v33 = vpop.f32.mrb[0].mxu1 }
 0x1b7   :  { %v203_v34 = vadd.f32 %v301_v32, %v202_v33  ;;  %v353_v35 = vpop.f32.mrb[1].mxu1 }
 0x1b9   :  { %v206_v36 = vmax.f32 %v203_v34, 0.0 }
 0x1bb   :  { %363 = vmatmul.mubr.msk.f32.vlgmr.msra.gmra.mrb[2].mxu0 %vm218_vm6, %v206_v36 }
 0x28e   :  { %v288_v38 = vpop.f32.mrb[2].mxu0 }
 0x28f   :  { %v289_v39 = vadd.f32 %v303_v37, %v288_v38  ;;  %v364_v40 = vpop.f32.mrb[3].mxu0 }
 0x291   :  { %293 = vst.msk [vmem:[%s511_s7] sm:$0xff] %vm292_vm7, %v289_v39 }

</bundles_post_ra>
